<compile_context>
chip_gen: v6e
topology: v6e:2x2x1
jax: 0.10.0
libtpu: 0.0.40
codegen_flags: <defaults>
</compile_context>

<pallas_src>
import jax
import jax.numpy as jnp
from jax.experimental import pallas as pl
from jax.experimental.pallas import tpu as pltpu


def mlp_kernel(x0_ref, x1_ref, w1_ref, b1_ref, w2_ref, b2_ref,
               w3a_ref, w3b_ref, b3_ref, w4_ref, b4_ref, out_ref):
    cdt = w1_ref.dtype  # bf16 compute dtype for MXU inputs

    x0 = x0_ref[...].astype(cdt)
    x1 = x1_ref[...].astype(cdt)

    # fc1 / fc2 (f32 accumulation)
    h0 = jnp.dot(x0, w1_ref[...], preferred_element_type=jnp.float32) + b1_ref[...]
    h1 = jnp.dot(x1, w2_ref[...], preferred_element_type=jnp.float32) + b2_ref[...]

    # fc3 on the (virtual) concat:  cat(h0,h1) @ W3.T == h0 @ W3a + h1 @ W3b
    h = (jnp.dot(h0.astype(cdt), w3a_ref[...], preferred_element_type=jnp.float32)
         + jnp.dot(h1.astype(cdt), w3b_ref[...], preferred_element_type=jnp.float32)
         + b3_ref[...])

    # TODO(synk): nn.Dropout(p=0.3) is identity in eval mode; training-mode
    # stochastic masking (torch RNG semantics) is not reproduced here.
    h = jnp.maximum(h, 0.0)  # ReLU

    # fc4 (class dim padded to 128 lanes; padded biases are -1e30)
    logits = (jnp.dot(h.astype(cdt), w4_ref[...],
                      preferred_element_type=jnp.float32) + b4_ref[...])

    # softmax over dim=1, f32, exact division
    m = jnp.max(logits, axis=1, keepdims=True)
    e = jnp.exp(logits - m)          # padded classes underflow to exactly 0
    denom = jnp.sum(e, axis=1, keepdims=True)
    out_ref[...] = (e / denom).astype(out_ref.dtype)


def prepare_params(params, compute_dtype=jnp.bfloat16):
    """One-time weight layout prep (call once, reuse across forward calls).

    `params` holds torch-layout weights (out, in) and biases (out,).
    Returns kernel-layout weights (transposed, bf16) and f32 (1, F) biases;
    fc4 is padded to 128 output classes for a lane-dense output store.
    """
    h1 = params["w1"].shape[0]
    h2 = params["w3"].shape[0]
    c = params["w4"].shape[0]
    cp = ((c + 127) // 128) * 128                     # lane-dense class dim

    w3t = params["w3"].T                              # (2*H1, H2)
    w4p = jnp.zeros((h2, cp), jnp.float32).at[:, :c].set(params["w4"].T)
    b4p = jnp.full((1, cp), -1e30, jnp.float32).at[0, :c].set(params["b4"])

    return dict(
        w1=params["w1"].T.astype(compute_dtype),       # (in, H1)
        b1=params["b1"].reshape(1, h1).astype(jnp.float32),
        w2=params["w2"].T.astype(compute_dtype),       # (in, H1)
        b2=params["b2"].reshape(1, h1).astype(jnp.float32),
        w3a=w3t[:h1].astype(compute_dtype),            # (H1, H2)
        w3b=w3t[h1:].astype(compute_dtype),             # (H1, H2)
        b3=params["b3"].reshape(1, h2).astype(jnp.float32),
        w4=w4p.astype(compute_dtype),                   # (H2, 128)
        b4=b4p,                                         # (1, 128)
        num_classes=c,
    )


def _pick_batch_tile(B):
    if B <= 256:
        # tiny batch: smallest bf16-friendly tile, minimal padding
        return ((B + 15) // 16) * 16
    # large batch: big tiles (mult of 256), >= 2 grid steps for v7x megacore
    return min(2048, ((pl.cdiv(B, 2) + 255) // 256) * 256)


def mlp_forward(x0, x1, prepped):
    """Forward pass. `prepped` is the output of prepare_params()."""
    B, in_f = x0.shape
    Cp = prepped["w4"].shape[1]
    C = prepped["num_classes"]

    TB = _pick_batch_tile(B)
    B_pad = pl.cdiv(B, TB) * TB
    if B_pad != B:
        x0 = jnp.pad(x0, ((0, B_pad - B), (0, 0)))
        x1 = jnp.pad(x1, ((0, B_pad - B), (0, 0)))

    def weight_spec(arr):
        return pl.BlockSpec(arr.shape, lambda i: (0, 0))

    out = pl.pallas_call(
        mlp_kernel,
        out_shape=jax.ShapeDtypeStruct((B_pad, Cp), jnp.float32),
        grid=(B_pad // TB,),
        in_specs=[
            pl.BlockSpec((TB, in_f), lambda i: (i, 0)),   # x0 (batch-tiled)
            pl.BlockSpec((TB, in_f), lambda i: (i, 0)),   # x1 (batch-tiled)
            weight_spec(prepped["w1"]), weight_spec(prepped["b1"]),
            weight_spec(prepped["w2"]), weight_spec(prepped["b2"]),
            weight_spec(prepped["w3a"]), weight_spec(prepped["w3b"]),
            weight_spec(prepped["b3"]),
            weight_spec(prepped["w4"]), weight_spec(prepped["b4"]),
        ],
        out_specs=pl.BlockSpec((TB, Cp), lambda i: (i, 0)),
        compiler_params=pltpu.CompilerParams(
            dimension_semantics=("parallel",)),
    )(x0, x1, prepped["w1"], prepped["b1"], prepped["w2"], prepped["b2"],
      prepped["w3a"], prepped["w3b"], prepped["b3"],
      prepped["w4"], prepped["b4"])

    out = out[:, :C]
    return out[:B] if B_pad != B else out


def init_params(key, input_size, h1, h2, num_classes):
    """Deterministic init mimicking nn.Linear's uniform(-1/sqrt(in), 1/sqrt(in))."""
    ks = jax.random.split(key, 8)

    def lin(kw, kb, out_f, in_f):
        bound = 1.0 / jnp.sqrt(in_f)
        w = jax.random.uniform(kw, (out_f, in_f), jnp.float32, -bound, bound)
        b = jax.random.uniform(kb, (out_f,), jnp.float32, -bound, bound)
        return w, b

    w1, b1 = lin(ks[0], ks[1], h1, input_size)
    w2, b2 = lin(ks[2], ks[3], h1, input_size)
    w3, b3 = lin(ks[4], ks[5], h2, 2 * h1)
    w4, b4 = lin(ks[6], ks[7], num_classes, h2)
    return dict(w1=w1, b1=b1, w2=w2, b2=b2, w3=w3, b3=b3, w4=w4, b4=b4)


if __name__ == "__main__":
    input_size, hidden_1, hidden_2, num_classes = 32, 64, 32, 8
    batch = 8

    key = jax.random.PRNGKey(0)
    k_x0, k_x1, k_p = jax.random.split(key, 3)
    x0 = jax.random.normal(k_x0, (batch, input_size), jnp.float32)
    x1 = jax.random.normal(k_x1, (batch, input_size), jnp.float32)
    params = init_params(k_p, input_size, hidden_1, hidden_2, num_classes)

    # One-time weight layout prep (hoisted out of the per-call path).
    prepped = prepare_params(params)
    jax.block_until_ready([v for v in prepped.values()
                           if isinstance(v, jnp.ndarray)])

    out = mlp_forward(x0, x1, prepped)
    jax.block_until_ready(out)

    # sanity: shape and softmax rows sum to 1
    assert out.shape == (batch, num_classes)
    assert jnp.allclose(jnp.sum(out, axis=1), 1.0, atol=1e-4)

    # cross-check against a pure-JAX f32 reference of the torch module
    def ref(x0, x1, p):
        h0 = x0 @ p["w1"].T + p["b1"]
        h1 = x1 @ p["w2"].T + p["b2"]
        h = jnp.concatenate([h0, h1], axis=1) @ p["w3"].T + p["b3"]
        h = jnp.maximum(h, 0.0)
        logits = h @ p["w4"].T + p["b4"]
        return jax.nn.softmax(logits, axis=1)

    assert jnp.allclose(out, ref(x0, x1, params), atol=2e-2)

    print("KERNEL_OK")
</pallas_src>

<mosaic_0001>
module attributes {stable_mosaic.version = 11 : i64} {
  func.func @mlp_kernel(%arg0: i32, %arg1: memref<16x32xf32, #tpu.memory_space<vmem>>, %arg2: memref<16x32xf32, #tpu.memory_space<vmem>>, %arg3: memref<32x64xbf16, #tpu.memory_space<vmem>>, %arg4: memref<1x64xf32, #tpu.memory_space<vmem>>, %arg5: memref<32x64xbf16, #tpu.memory_space<vmem>>, %arg6: memref<1x64xf32, #tpu.memory_space<vmem>>, %arg7: memref<64x32xbf16, #tpu.memory_space<vmem>>, %arg8: memref<64x32xbf16, #tpu.memory_space<vmem>>, %arg9: memref<1x32xf32, #tpu.memory_space<vmem>>, %arg10: memref<32x128xbf16, #tpu.memory_space<vmem>>, %arg11: memref<1x128xf32, #tpu.memory_space<vmem>>, %arg12: memref<16x128xf32, #tpu.memory_space<vmem>>) attributes {dimension_semantics = [#tpu.dimension_semantics<parallel>], iteration_bounds = array<i64: 1>, scalar_prefetch = 0 : i64, scratch_operands = 0 : i64, tpu.core_type = #tpu.core_type<tc>, window_params = [{transform_indices = @transform_0, window_bounds = array<i64: 16, 32>}, {transform_indices = @transform_1, window_bounds = array<i64: 16, 32>}, {pipeline_mode = #tpu.pipeline_mode<synchronous>, transform_indices = @transform_2, window_bounds = array<i64: 32, 64>}, {pipeline_mode = #tpu.pipeline_mode<synchronous>, transform_indices = @transform_3, window_bounds = array<i64: 1, 64>}, {pipeline_mode = #tpu.pipeline_mode<synchronous>, transform_indices = @transform_4, window_bounds = array<i64: 32, 64>}, {pipeline_mode = #tpu.pipeline_mode<synchronous>, transform_indices = @transform_5, window_bounds = array<i64: 1, 64>}, {pipeline_mode = #tpu.pipeline_mode<synchronous>, transform_indices = @transform_6, window_bounds = array<i64: 64, 32>}, {pipeline_mode = #tpu.pipeline_mode<synchronous>, transform_indices = @transform_7, window_bounds = array<i64: 64, 32>}, {pipeline_mode = #tpu.pipeline_mode<synchronous>, transform_indices = @transform_8, window_bounds = array<i64: 1, 32>}, {pipeline_mode = #tpu.pipeline_mode<synchronous>, transform_indices = @transform_9, window_bounds = array<i64: 32, 128>}, {pipeline_mode = #tpu.pipeline_mode<synchronous>, transform_indices = @transform_10, window_bounds = array<i64: 1, 128>}, {transform_indices = @transform_11, window_bounds = array<i64: 16, 128>}]} {
    %c0 = arith.constant 0 : index
    %c0_0 = arith.constant 0 : index
    %0 = vector.load %arg1[%c0, %c0_0] : memref<16x32xf32, #tpu.memory_space<vmem>>, vector<16x32xf32>
    %1 = arith.truncf %0 : vector<16x32xf32> to vector<16x32xbf16>
    %c0_1 = arith.constant 0 : index
    %c0_2 = arith.constant 0 : index
    %2 = vector.load %arg2[%c0_1, %c0_2] : memref<16x32xf32, #tpu.memory_space<vmem>>, vector<16x32xf32>
    %3 = arith.truncf %2 : vector<16x32xf32> to vector<16x32xbf16>
    %c0_3 = arith.constant 0 : index
    %c0_4 = arith.constant 0 : index
    %4 = vector.load %arg3[%c0_3, %c0_4] : memref<32x64xbf16, #tpu.memory_space<vmem>>, vector<32x64xbf16>
    %cst = arith.constant dense<0.000000e+00> : vector<16x64xf32>
    %5 = tpu.matmul %1, %4, %cst {dimension_numbers = #tpu.dot_dimension_numbers<[1], [0], [0], [1], [0, 0, 1, 1], [], []>} : vector<16x32xbf16>, vector<32x64xbf16>, vector<16x64xf32> -> vector<16x64xf32>
    %c0_5 = arith.constant 0 : index
    %c0_6 = arith.constant 0 : index
    %6 = vector.load %arg4[%c0_5, %c0_6] : memref<1x64xf32, #tpu.memory_space<vmem>>, vector<1x64xf32>
    %7 = vector.broadcast %6 : vector<1x64xf32> to vector<16x64xf32>
    %8 = arith.addf %5, %7 : vector<16x64xf32>
    %c0_7 = arith.constant 0 : index
    %c0_8 = arith.constant 0 : index
    %9 = vector.load %arg5[%c0_7, %c0_8] : memref<32x64xbf16, #tpu.memory_space<vmem>>, vector<32x64xbf16>
    %cst_9 = arith.constant dense<0.000000e+00> : vector<16x64xf32>
    %10 = tpu.matmul %3, %9, %cst_9 {dimension_numbers = #tpu.dot_dimension_numbers<[1], [0], [0], [1], [0, 0, 1, 1], [], []>} : vector<16x32xbf16>, vector<32x64xbf16>, vector<16x64xf32> -> vector<16x64xf32>
    %c0_10 = arith.constant 0 : index
    %c0_11 = arith.constant 0 : index
    %11 = vector.load %arg6[%c0_10, %c0_11] : memref<1x64xf32, #tpu.memory_space<vmem>>, vector<1x64xf32>
    %12 = vector.broadcast %11 : vector<1x64xf32> to vector<16x64xf32>
    %13 = arith.addf %10, %12 : vector<16x64xf32>
    %14 = arith.truncf %8 : vector<16x64xf32> to vector<16x64xbf16>
    %c0_12 = arith.constant 0 : index
    %c0_13 = arith.constant 0 : index
    %15 = vector.load %arg7[%c0_12, %c0_13] : memref<64x32xbf16, #tpu.memory_space<vmem>>, vector<64x32xbf16>
    %cst_14 = arith.constant dense<0.000000e+00> : vector<16x32xf32>
    %16 = tpu.matmul %14, %15, %cst_14 {dimension_numbers = #tpu.dot_dimension_numbers<[1], [0], [0], [1], [0, 0, 1, 1], [], []>} : vector<16x64xbf16>, vector<64x32xbf16>, vector<16x32xf32> -> vector<16x32xf32>
    %17 = arith.truncf %13 : vector<16x64xf32> to vector<16x64xbf16>
    %c0_15 = arith.constant 0 : index
    %c0_16 = arith.constant 0 : index
    %18 = vector.load %arg8[%c0_15, %c0_16] : memref<64x32xbf16, #tpu.memory_space<vmem>>, vector<64x32xbf16>
    %cst_17 = arith.constant dense<0.000000e+00> : vector<16x32xf32>
    %19 = tpu.matmul %17, %18, %cst_17 {dimension_numbers = #tpu.dot_dimension_numbers<[1], [0], [0], [1], [0, 0, 1, 1], [], []>} : vector<16x64xbf16>, vector<64x32xbf16>, vector<16x32xf32> -> vector<16x32xf32>
    %20 = arith.addf %16, %19 : vector<16x32xf32>
    %c0_18 = arith.constant 0 : index
    %c0_19 = arith.constant 0 : index
    %21 = vector.load %arg9[%c0_18, %c0_19] : memref<1x32xf32, #tpu.memory_space<vmem>>, vector<1x32xf32>
    %22 = vector.broadcast %21 : vector<1x32xf32> to vector<16x32xf32>
    %23 = arith.addf %20, %22 : vector<16x32xf32>
    %cst_20 = arith.constant 0.000000e+00 : f32
    %24 = vector.broadcast %cst_20 : f32 to vector<16x32xf32>
    %25 = arith.maximumf %23, %24 : vector<16x32xf32>
    %26 = arith.truncf %25 : vector<16x32xf32> to vector<16x32xbf16>
    %c0_21 = arith.constant 0 : index
    %c0_22 = arith.constant 0 : index
    %27 = vector.load %arg10[%c0_21, %c0_22] : memref<32x128xbf16, #tpu.memory_space<vmem>>, vector<32x128xbf16>
    %cst_23 = arith.constant dense<0.000000e+00> : vector<16x128xf32>
    %28 = tpu.matmul %26, %27, %cst_23 {dimension_numbers = #tpu.dot_dimension_numbers<[1], [0], [0], [1], [0, 0, 1, 1], [], []>} : vector<16x32xbf16>, vector<32x128xbf16>, vector<16x128xf32> -> vector<16x128xf32>
    %c0_24 = arith.constant 0 : index
    %c0_25 = arith.constant 0 : index
    %29 = vector.load %arg11[%c0_24, %c0_25] : memref<1x128xf32, #tpu.memory_space<vmem>>, vector<1x128xf32>
    %30 = vector.broadcast %29 : vector<1x128xf32> to vector<16x128xf32>
    %31 = arith.addf %28, %30 : vector<16x128xf32>
    %cst_26 = arith.constant dense<0xFF800000> : vector<16xf32>
    %32 = vector.multi_reduction <maximumf>, %31, %cst_26 [1] : vector<16x128xf32> to vector<16xf32>
    %33 = vector.shape_cast %32 : vector<16xf32> to vector<16x1xf32>
    %34 = vector.broadcast %33 : vector<16x1xf32> to vector<16x128xf32>
    %35 = arith.subf %31, %34 : vector<16x128xf32>
    %36 = math.exp %35 : vector<16x128xf32>
    %cst_27 = arith.constant dense<0.000000e+00> : vector<16xf32>
    %37 = vector.multi_reduction <add>, %36, %cst_27 [1] : vector<16x128xf32> to vector<16xf32>
    %38 = vector.shape_cast %37 : vector<16xf32> to vector<16x1xf32>
    %39 = vector.broadcast %38 : vector<16x1xf32> to vector<16x128xf32>
    %40 = arith.divf %36, %39 : vector<16x128xf32>
    %c0_28 = arith.constant 0 : index
    %c0_29 = arith.constant 0 : index
    %41 = vector.load %arg12[%c0_28, %c0_29] : memref<16x128xf32, #tpu.memory_space<vmem>>, vector<16x128xf32>
    tpu.vector_store %arg12[%c0_28, %c0_29], %40 {strides = array<i32>} : memref<16x128xf32, #tpu.memory_space<vmem>>, vector<16x128xf32>,
    return
  }
  func.func @transform_0(%arg0: i32) -> (i32, i32) {
    %c0_i32 = arith.constant 0 : i32
    %c0_i32_0 = arith.constant 0 : i32
    return %arg0, %c0_i32 : i32, i32
  }
  func.func @transform_1(%arg0: i32) -> (i32, i32) {
    %c0_i32 = arith.constant 0 : i32
    %c0_i32_0 = arith.constant 0 : i32
    return %arg0, %c0_i32 : i32, i32
  }
  func.func @transform_2(%arg0: i32) -> (i32, i32) {
    %c0_i32 = arith.constant 0 : i32
    %c0_i32_0 = arith.constant 0 : i32
    %c0_i32_1 = arith.constant 0 : i32
    return %c0_i32, %c0_i32_0 : i32, i32
  }
  func.func @transform_3(%arg0: i32) -> (i32, i32) {
    %c0_i32 = arith.constant 0 : i32
    %c0_i32_0 = arith.constant 0 : i32
    %c0_i32_1 = arith.constant 0 : i32
    return %c0_i32, %c0_i32_0 : i32, i32
  }
  func.func @transform_4(%arg0: i32) -> (i32, i32) {
    %c0_i32 = arith.constant 0 : i32
    %c0_i32_0 = arith.constant 0 : i32
    %c0_i32_1 = arith.constant 0 : i32
    return %c0_i32, %c0_i32_0 : i32, i32
  }
  func.func @transform_5(%arg0: i32) -> (i32, i32) {
    %c0_i32 = arith.constant 0 : i32
    %c0_i32_0 = arith.constant 0 : i32
    %c0_i32_1 = arith.constant 0 : i32
    return %c0_i32, %c0_i32_0 : i32, i32
  }
  func.func @transform_6(%arg0: i32) -> (i32, i32) {
    %c0_i32 = arith.constant 0 : i32
    %c0_i32_0 = arith.constant 0 : i32
    %c0_i32_1 = arith.constant 0 : i32
    return %c0_i32, %c0_i32_0 : i32, i32
  }
  func.func @transform_7(%arg0: i32) -> (i32, i32) {
    %c0_i32 = arith.constant 0 : i32
    %c0_i32_0 = arith.constant 0 : i32
    %c0_i32_1 = arith.constant 0 : i32
    return %c0_i32, %c0_i32_0 : i32, i32
  }
  func.func @transform_8(%arg0: i32) -> (i32, i32) {
    %c0_i32 = arith.constant 0 : i32
    %c0_i32_0 = arith.constant 0 : i32
    %c0_i32_1 = arith.constant 0 : i32
    return %c0_i32, %c0_i32_0 : i32, i32
  }
  func.func @transform_9(%arg0: i32) -> (i32, i32) {
    %c0_i32 = arith.constant 0 : i32
    %c0_i32_0 = arith.constant 0 : i32
    %c0_i32_1 = arith.constant 0 : i32
    return %c0_i32, %c0_i32_0 : i32, i32
  }
  func.func @transform_10(%arg0: i32) -> (i32, i32) {
    %c0_i32 = arith.constant 0 : i32
    %c0_i32_0 = arith.constant 0 : i32
    %c0_i32_1 = arith.constant 0 : i32
    return %c0_i32, %c0_i32_0 : i32, i32
  }
  func.func @transform_11(%arg0: i32) -> (i32, i32) {
    %c0_i32 = arith.constant 0 : i32
    %c0_i32_0 = arith.constant 0 : i32
    return %arg0, %c0_i32 : i32, i32
  }
}

</mosaic_0001>

<bundles_post_ra>
// kernel: tpu_custom_call.1
= control target key start
LH: loop header
LB: loop body
LE: loop exit
PB: predicated region body
PF: predicated region fallthrough
CT: control target
= control target key end

     0   :  { %v590_v1 = vmov 0.0   ;;  %vm591_vm0 = vmmov 0   ;;  %vm69_vm1 = vcmask 261120   ;;  %s751_s0 = inlined_call_operand.vmem [shape: f32[16,32], index: 0, kind: input, shape index: {}]   ;;  %s752_s1 = inlined_call_operand.vmem [shape: f32[16,32], index: 1, kind: input, shape index: {}]   ;;  %s753_s2 = inlined_call_operand.vmem [shape: bf16[32,64], index: 2, kind: input, shape index: {}]   ;;  %s754_s3 = inlined_call_operand.vmem [shape: f32[1,64], index: 3, kind: input, shape index: {}]   ;;  %s755_s4 = inlined_call_operand.vmem [shape: bf16[32,64], index: 4, kind: input, shape index: {}]   ;;  %s756_s5 = inlined_call_operand.vmem [shape: f32[1,64], index: 5, kind: input, shape index: {}]   ;;  %s757_s6 = inlined_call_operand.vmem [shape: bf16[64,32], index: 6, kind: input, shape index: {}]   ;;  %s758_s7 = inlined_call_operand.vmem [shape: bf16[64,32], index: 7, kind: input, shape index: {}]   ;;  %s759_s8 = inlined_call_operand.vmem [shape: f32[1,32], index: 8, kind: input, shape index: {}]   ;;  %s760_s9 = inlined_call_operand.vmem [shape: bf16[32,128], index: 9, kind: input, shape index: {}]   ;;  %s761_s10 = inlined_call_operand.vmem [shape: f32[1,128], index: 10, kind: input, shape index: {}]   ;;  %s762_s11 = inlined_call_operand.hbm [shape: f32[16,128], index: 11, kind: output, shape index: {}]  }
   0x1   :  { %v546_v0 = vld [vmem:[%s753_s2 + $0x8] sm:$0xff]   ;;  %493 = vmatprep.subr.bf16.mxu0 %v590_v1  ;;  %501 = vmatprep.subr.bf16.mxu1 %v590_v1  ;;  %v548_v3 = vld [vmem:[%s753_s2] sm:$0xff]   ;;  %v550_v11 = vld [vmem:[%s758_s7 + $0x18] sm:$0xff]  }
   0x2   :  { %v547_v2 = vld [vmem:[%s755_s4 + $0x8] sm:$0xff]   ;;  %494 = vmatpush3.bf16.msra.mxu0 %v546_v0  ;;  %497 = vmatprep.mubr.msk.bf16.mxu0 %vm591_vm0, %v590_v1  ;;  %v549_v4 = vld [vmem:[%s755_s4] sm:$0xff]   ;;  %v551_v12 = vld [vmem:[%s757_s6 + $0x18] sm:$0xff]  }
   0x3   :  { %502 = vmatpush3.bf16.msra.mxu1 %v547_v2  ;;  %495 = vmatprep.subr.bf16.mxu0 %v590_v1  ;;  %v40_v5 = vld [vmem:[%s751_s0] sm:$0xff]  ;;  %v41_v6 = vld [vmem:[%s751_s0 + $0x8] sm:$0xff]  ;;  %v552_v13 = vld [vmem:[%s758_s7 + $0x10] sm:$0xff]  }
   0x4   :  { %503 = vmatprep.subr.bf16.mxu1 %v590_v1  ;;  %505 = vmatprep.mubr.msk.bf16.mxu1 %vm591_vm0, %v590_v1  ;;  %v43_v7 = vld [vmem:[%s752_s1] sm:$0xff]  ;;  %v42_v8 = vpack.c.bf16 %v41_v6, %v40_v5  ;;  %v44_v9 = vld [vmem:[%s752_s1 + $0x8] sm:$0xff]  ;;  %v553_v14 = vld [vmem:[%s757_s6 + $0x10] sm:$0xff]  }
   0x5   :  { %v45_v10 = vpack.c.bf16 %v44_v9, %v43_v7 }
   0x6   :  { %496 = vmatpush3.bf16.msra.mxu0 %v548_v3 }
   0x7   :  { %504 = vmatpush3.bf16.msra.mxu1 %v549_v4  ;;  %509 = vmatprep.subr.bf16.mxu0 %v590_v1 }
   0x8   :  { %521 = vmatprep.subr.bf16.mxu1 %v590_v1 }
   0x9   :  { %498 = vmatmul.mubr.msk.bf16.vlgmr.msra.gmra.mxu0 %vm69_vm1, %v42_v8 }
   0xa   :  { %506 = vmatmul.mubr.msk.bf16.vlgmr.msra.gmra.mxu1 %vm69_vm1, %v45_v10  ;;  %510 = vmatpush3.bf16.msra.mxu0 %v550_v11 }
   0xb   :  { %522 = vmatpush3.bf16.msra.mxu1 %v551_v12  ;;  %511 = vmatprep.subr.bf16.mxu0 %v590_v1 }
   0xc   :  { %523 = vmatprep.subr.bf16.mxu1 %v590_v1  ;;  %517 = vmatprep.mubr.msk.bf16.mxu0 %vm591_vm0, %v590_v1 }
   0xd   :  { %529 = vmatprep.mubr.msk.bf16.mxu1 %vm591_vm0, %v590_v1 }
   0xe   :  { %16 = vsyncpa [#allocation3], 0  ;;  %512 = vmatpush3.bf16.msra.mxu0 %v552_v13  ;;  %v554_v15 = vld [vmem:[%s758_s7 + $0x8] sm:$0xff]   ;;  %v556_v17 = vld [vmem:[%s758_s7] sm:$0xff]   ;;  %vm223_vm2 = vcmask 523264  }
   0xf   :  { %524 = vmatpush3.bf16.msra.mxu1 %v553_v14  ;;  %513 = vmatprep.subr.bf16.mxu0 %v590_v1  ;;  %v555_v16 = vld [vmem:[%s757_s6 + $0x8] sm:$0xff]   ;;  %v557_v18 = vld [vmem:[%s757_s6] sm:$0xff]  }
  0x10   :  { %525 = vmatprep.subr.bf16.mxu1 %v590_v1  ;;  %v451_v21 = vld [vmem:[%s754_s3] ss:$0 sm:$0xff]  ;;  %v558_v35 = vld [vmem:[%s760_s9 + $0x8] sm:$0xff]  }
  0x11   :  { %v455_v23 = vld [vmem:[%s756_s5] ss:$0 sm:$0xff] }
  0x12   :  { %514 = vmatpush3.bf16.msra.mxu0 %v554_v15  ;;  %v559_v36 = vld [vmem:[%s760_s9] sm:$0xff]  }
  0x13   :  { %526 = vmatpush3.bf16.msra.mxu1 %v555_v16  ;;  %515 = vmatprep.subr.bf16.mxu0 %v590_v1  ;;  %v469_v41 = vld [vmem:[%s759_s8] ss:$0 sm:$0xff]  ;;  %s592_s8 = smov [#allocation2]  }
  0x14   :  { %527 = vmatprep.subr.bf16.mxu1 %v590_v1  ;;  %v470_v53 = vld [vmem:[%s761_s10] ss:$0 sm:$0xff]  ;;  %s440_s10 = sshll.u32 %s592_s8, 4  ;;  %s441_s10 = int_to_ptr.vmem [resolvable:$true] %s440_s10 }
  0x15   :  { %s568_s12 = scalar_lea.vmem %s441_s10, 256  ;;  %p573_p1 = scmp.lt.s32.totalorder %s441_s10, %s441_s10 }
  0x16   :  { %516 = vmatpush3.bf16.msra.mxu0 %v556_v17  ;;  %p569_p0 = scmp.ne.s32.totalorder %s441_s10, %s568_s12  ;;  %p574_p2 = scmp.lt.s32.totalorder %s568_s12, %s568_s12 }
  0x17   :  { %528 = vmatpush3.bf16.msra.mxu1 %v557_v18  ;;  %533 = vmatprep.subr.bf16.mxu0 %v590_v1 }
  0x18   :  { %p575_p3 = por %p574_p2, %p573_p1 }
  0x1a   :  { %p576_p4 = pnand %p575_p3, %p569_p0 }
  0xc9   :  { %v107_v19 = vpop.f32.mrf.mxu0 }
  0xca   :  { %v174_v20 = vpop.f32.mrf.mxu1  ;;  %v108_v26 = vadd.f32 %v451_v21, %v107_v19 }
  0xcb   :  { %v499_v22 = vpop.f32.mrf.mxu0  ;;  %v175_v29 = vadd.f32 %v455_v23, %v174_v20 }
  0xcc   :  { %v507_v24 = vpop.f32.mrf.mxu1 }
  0xcd   :  { %v110_v25 = vpop.f32.mrf.mxu0 }
  0xce   :  { %v111_v27 = vadd.f32 %v451_v21, %v110_v25  ;;  %v177_v28 = vpop.f32.mrf.mxu1 }
  0xcf   :  { %v178_v30 = vadd.f32 %v455_v23, %v177_v28  ;;  %v500_v31 = vpop.f32.mrf.mxu0 }
  0xd0   :  { %v181_v32 = vpack.c.bf16 %v111_v27, %v108_v26  ;;  %v508_v33 = vpop.f32.mrf.mxu1 }
  0xd1   :  { %v190_v34 = vpack.c.bf16 %v178_v30, %v175_v29 }
  0xd2   :  { %530 = vmatmul.mubr.msk.bf16.vlgmr.msra.gmra.mxu1 %vm223_vm2, %v181_v32 }
  0xd3   :  { %518 = vmatmul.mubr.msk.bf16.vlgmr.msra.gmra.mxu0 %vm223_vm2, %v190_v34 }
  0xd4   :  { %537 = vmatprep.mubr.msk.bf16.mxu0 %vm591_vm0, %v590_v1  ;;  %534 = vmatpush3.bf16.msra.mxu0 %v558_v35 }
  0xd5   :  { %535 = vmatprep.subr.bf16.mxu0 %v590_v1 }
  0xd8   :  { %536 = vmatpush3.bf16.msra.mxu0 %v559_v36 }
 0x192   :  { %v329_v37 = vpop.f32.mrf.mxu1 }
 0x193   :  { %v261_v38 = vpop.f32.mrf.mxu0 }
 0x194   :  { %v330_v39 = vadd.f32 %v329_v37, %v261_v38  ;;  %v531_v40 = vpop.f32.mrf.mxu1 }
 0x195   :  { %v519_v42 = vpop.f32.mrf.mxu0 }
 0x196   :  { %v332_v43 = vpop.f32.mrf.mxu1  ;;  %v343_v45 = vadd.f32 %v469_v41, %v330_v39 }
 0x197   :  { %v264_v44 = vpop.f32.mrf.mxu0 }
 0x198   :  { %v333_v46 = vadd.f32 %v332_v43, %v264_v44  ;;  %v532_v47 = vpop.f32.mrf.mxu1  ;;  %v345_v50 = vmax.f32 %v343_v45, 0.0 }
 0x199   :  { %v520_v48 = vpop.f32.mrf.mxu0 }
 0x19a   :  { %v344_v49 = vadd.f32 %v469_v41, %v333_v46 }
 0x19c   :  { %v346_v51 = vmax.f32 %v344_v49, 0.0 }
 0x19e   :  { %v347_v52 = vpack.c.bf16 %v346_v51, %v345_v50 }
 0x1a0   :  { %538 = vmatmul.mubr.msk.bf16.vlgmr.msra.gmra.mxu0 %vm69_vm1, %v347_v52 }
 0x260   :  { %v408_v54 = vpop.f32.mrf.mxu0 }
 0x261   :  { %v409_v55 = vadd.f32 %v470_v53, %v408_v54 }
 0x262   :  { %v539_v56 = vpop.f32.mrf.mxu0 }
 0x263   :  { %415 = vmax.xlane.f32.xlu0 %v409_v55 }
 0x264   :  { %v411_v57 = vpop.f32.mrf.mxu0 }
 0x265   :  { %v412_v58 = vadd.f32 %v470_v53, %v411_v57 }
 0x266   :  { %v540_v59 = vpop.f32.mrf.mxu0 }
 0x267   :  { %417 = vmax.xlane.f32.xlu0 %v412_v58 }
 0x2ec   :  { %v416_v60 = vpop.xlane.xlu0 %415 }
 0x2ed   :  { %v419_v61 = vsub.f32 %v409_v55, %v416_v60 }
 0x2ef   :  { %v421_v62 = vmul.f32 1.442695, %v419_v61 }
 0x2f0   :  { %v418_v63 = vpop.xlane.xlu0 %417 }
 0x2f1   :  { %560 = vpow2.f32 %v421_v62  ;;  %v420_v0 = vsub.f32 %v412_v58, %v418_v63 }
 0x2f3   :  { %v423_v1 = vmul.f32 1.442695, %v420_v0 }
 0x2f5   :  { %562 = vpow2.f32 %v423_v1 }
 0x2fe   :  { %v561_v2 = vpop.eup %560 }
 0x2ff   :  { %425 = vadd.xlane.f32.xlu1 %v561_v2 }
 0x302   :  { %v563_v3 = vpop.eup %562 }
 0x303   :  { %427 = vadd.xlane.f32.xlu1 %v563_v3 }
 0x388   :  { %v426_v4 = vpop.xlane.xlu1 %425 }
 0x389   :  { %564 = vrcp.f32 %v426_v4 }
 0x38c   :  { %v428_v5 = vpop.xlane.xlu1 %427 }
 0x38d   :  { %566 = vrcp.f32 %v428_v5 }
 0x396   :  { %v565_v6 = vpop.eup %564 }
 0x397   :  { %v430_v7 = vmul.f32 %v565_v6, %v561_v2 }
 0x399   :  { %433 = vst [vmem:[#allocation2] sm:$0xff] %v430_v7 }
 0x39a   :  { %v567_v8 = vpop.eup %566 }
 0x39b   :  { %v432_v9 = vmul.f32 %v567_v8, %v563_v3 }
 0x39d   :  { %434 = vst [vmem:[#allocation2 + $0x8] sm:$0xff] %v432_v9 }
 0x39e   :  { %579 = shalt.err (!%p576_p4)
}
 0x39f   :  { %s593_s13 = smov 128   ;;  %s594_s0 = smov 8  }
 0x3a0   :  { %446 = dma.vmem_to_hbm [thread:$0]  %s441_s10, 256, %s762_s11, [#allocation3], %s593_s13, %s593_s13, %s594_s0  }
 0x3a1   :  { %588 = dma.done.wait [#allocation3], 256  }
 0x3a2   :  { %589 = vsyncadd [#allocation3], 4294967040 }
 0x3a3   :  { %450 = vsyncpa [#allocation3], 1 }

</bundles_post_ra>
